<compile_context>
chip_gen: v7x
topology: tpu7x:2x2x1
jax: 0.10.0
libtpu: 0.0.40
codegen_flags: <defaults>
</compile_context>

<pallas_src>
import functools

import jax
import jax.numpy as jnp
from jax import lax
from jax.experimental import pallas as pl
from jax.experimental.pallas import tpu as pltpu

# ---------------- small, module-consistent config ----------------
B = 2            # batch
SEQ = 8          # tokens (sublane-aligned)
DIM = 32         # embedding dim C
HEADS = 4        # num_heads
HEAD_DIM = DIM // HEADS


# ---------------- fused attention kernel (single invocation, no grid) -------------
def _attention_kernel(x_ref, wqkv_ref, wproj_ref, bproj_ref, o_ref, *,
                      batch, seq, num_heads):
    x = x_ref[...]                                  # (B*N, C) flattened tokens
    _, C = x.shape
    dh = C // num_heads

    # QKV projection for all tokens of all batches in one MXU pass.
    # (1/sqrt(dh) is pre-folded into the Q columns of wqkv; qkv_bias=False.)
    qkv = jnp.dot(x, wqkv_ref[...], preferred_element_type=jnp.float32)   # (B*N, 3C)

    bias = bproj_ref[...]                           # (1, C)

    # Per-(batch, head) scaled-dot-product attention, statically unrolled.
    # Column layout of qkv matches PyTorch's reshape(B,N,3,H,dh): [q | k | v],
    # each of width C with heads as contiguous dh-wide chunks.
    for b in range(batch):
        r0 = b * seq
        y = jnp.zeros((seq, C), jnp.float32)        # f32 accumulator (one vreg)
        for h in range(num_heads):
            qh = qkv[r0:r0 + seq, h * dh:(h + 1) * dh]                     # (N, dh)
            kh = qkv[r0:r0 + seq, C + h * dh:C + (h + 1) * dh]             # (N, dh)
            vh = qkv[r0:r0 + seq, 2 * C + h * dh:2 * C + (h + 1) * dh]     # (N, dh)
            # q @ k^T without materializing a transpose (scale already folded in).
            s = lax.dot_general(qh, kh, (((1,), (1,)), ((), ())),
                                preferred_element_type=jnp.float32)        # (N, N)
            # numerically stable softmax; normalization via EUP approx reciprocal
            s = s - jnp.max(s, axis=-1, keepdims=True)
            e = jnp.exp(s)
            p = e * pl.reciprocal(jnp.sum(e, axis=-1, keepdims=True), approx=True)
            oh = jnp.dot(p, vh, preferred_element_type=jnp.float32)        # (N, dh)
            # Output projection accumulated per head (no lane-concat of heads):
            # concat_h(oh) @ Wproj == sum_h oh @ Wproj[h*dh:(h+1)*dh, :]
            y = y + jnp.dot(oh, wproj_ref[h * dh:(h + 1) * dh, :],
                            preferred_element_type=jnp.float32)            # (N, C)
        o_ref[r0:r0 + seq, :] = (y + bias).astype(o_ref.dtype)


def attention_forward(x, wqkv_scaled, wproj, bproj, *, num_heads=HEADS):
    """x: (B, N, C); wqkv_scaled: (C, 3C) pre-transposed with scale folded into the
    Q columns; wproj: (C, C) pre-transposed; bproj: (C,). Returns (B, N, C)."""
    Bq, N, C = x.shape
    x2 = x.reshape(Bq * N, C)                       # contiguous flatten, done by XLA
    kern = functools.partial(_attention_kernel, batch=Bq, seq=N, num_heads=num_heads)
    vmem = pl.BlockSpec(memory_space=pltpu.MemorySpace.VMEM)   # full array, VMEM-resident
    out = pl.pallas_call(
        kern,
        out_shape=jax.ShapeDtypeStruct((Bq * N, C), x.dtype),
        in_specs=[vmem, vmem, vmem, vmem],
        out_specs=vmem,
    )(x2, wqkv_scaled, wproj, bproj.reshape(1, C))
    return out.reshape(Bq, N, C)


# ---------------- pure-JAX reference (PyTorch semantics, unscaled weights) --------
def attention_reference(x, wqkv, wproj, bproj, num_heads=HEADS):
    Bq, N, C = x.shape
    dh = C // num_heads
    scale = dh ** -0.5
    qkv = x @ wqkv                                                   # (B, N, 3C)
    qkv = qkv.reshape(Bq, N, 3, num_heads, dh).transpose(2, 0, 3, 1, 4)
    q, k, v = qkv[0], qkv[1], qkv[2]                                 # (B, H, N, dh)
    attn = (q @ jnp.swapaxes(k, -2, -1)) * scale
    attn = jax.nn.softmax(attn, axis=-1)
    out = (attn @ v).transpose(0, 2, 1, 3).reshape(Bq, N, C)
    return out @ wproj + bproj


# ---------------- parameter init (deterministic, pre-transposed) ----------------
def init_params(key):
    kq, kp, kb = jax.random.split(key, 3)
    # Stored directly in (K, N) layout so no transpose is emitted at call time.
    wqkv = jax.random.normal(kq, (DIM, 3 * DIM), jnp.float32) * 0.02
    wproj = jax.random.normal(kp, (DIM, DIM), jnp.float32) * 0.02
    bproj = jax.random.normal(kb, (DIM,), jnp.float32) * 0.02
    return wqkv, wproj, bproj


def fold_scale_into_qkv(wqkv, num_heads=HEADS):
    """One-time init step: fold 1/sqrt(head_dim) into the Q columns of wqkv."""
    C = wqkv.shape[0]
    scale = (C // num_heads) ** -0.5
    col_scale = jnp.concatenate([jnp.full((C,), scale, wqkv.dtype),
                                 jnp.ones((2 * C,), wqkv.dtype)])
    return wqkv * col_scale[None, :]


if __name__ == "__main__":
    key = jax.random.PRNGKey(0)
    kx, kw = jax.random.split(key)
    x = jax.random.normal(kx, (B, SEQ, DIM), jnp.float32)            # (B, N, C)
    wqkv, wproj, bproj = init_params(kw)
    wqkv_scaled = fold_scale_into_qkv(wqkv)                          # one-time fold

    fwd = jax.jit(functools.partial(attention_forward, num_heads=HEADS))
    out = fwd(x, wqkv_scaled, wproj, bproj)
    jax.block_until_ready(out)

    assert out.shape == (B, SEQ, DIM), out.shape
    assert bool(jnp.all(jnp.isfinite(out)))

    ref = attention_reference(x, wqkv, wproj, bproj)
    # Tolerance loosened slightly vs. exact-divide version because the softmax
    # normalization now uses the EUP approximate reciprocal.
    assert bool(jnp.allclose(out, ref, atol=2e-3, rtol=1e-2)), (
        float(jnp.max(jnp.abs(out - ref))))

    print("KERNEL_OK")
</pallas_src>

<mosaic_0001>
module attributes {stable_mosaic.version = 11 : i64} {
  func.func @_attention_kernel(%arg0: memref<16x32xf32, #tpu.memory_space<vmem>>, %arg1: memref<32x96xf32, #tpu.memory_space<vmem>>, %arg2: memref<32x32xf32, #tpu.memory_space<vmem>>, %arg3: memref<1x32xf32, #tpu.memory_space<vmem>>, %arg4: memref<16x32xf32, #tpu.memory_space<vmem>>) attributes {dimension_semantics = [], scalar_prefetch = 0 : i64, scratch_operands = 0 : i64, tpu.core_type = #tpu.core_type<tc>} {
    %c0 = arith.constant 0 : index
    %c0_0 = arith.constant 0 : index
    %0 = vector.load %arg0[%c0, %c0_0] : memref<16x32xf32, #tpu.memory_space<vmem>>, vector<16x32xf32>
    %c0_1 = arith.constant 0 : index
    %c0_2 = arith.constant 0 : index
    %1 = vector.load %arg1[%c0_1, %c0_2] : memref<32x96xf32, #tpu.memory_space<vmem>>, vector<32x96xf32>
    %cst = arith.constant dense<0.000000e+00> : vector<16x96xf32>
    %2 = tpu.matmul %0, %1, %cst {dimension_numbers = #tpu.dot_dimension_numbers<[1], [0], [0], [1], [0, 0, 1, 1], [], []>} : vector<16x32xf32>, vector<32x96xf32>, vector<16x96xf32> -> vector<16x96xf32>
    %c0_3 = arith.constant 0 : index
    %c0_4 = arith.constant 0 : index
    %3 = vector.load %arg3[%c0_3, %c0_4] : memref<1x32xf32, #tpu.memory_space<vmem>>, vector<1x32xf32>
    %cst_5 = arith.constant 0.000000e+00 : f32
    %4 = vector.broadcast %cst_5 : f32 to vector<8x32xf32>
    %5 = vector.extract_strided_slice %2 {offsets = [0, 0], sizes = [8, 8], strides = [1, 1]} : vector<16x96xf32> to vector<8x8xf32>
    %6 = vector.extract_strided_slice %2 {offsets = [0, 32], sizes = [8, 8], strides = [1, 1]} : vector<16x96xf32> to vector<8x8xf32>
    %7 = vector.extract_strided_slice %2 {offsets = [0, 64], sizes = [8, 8], strides = [1, 1]} : vector<16x96xf32> to vector<8x8xf32>
    %cst_6 = arith.constant dense<0.000000e+00> : vector<8x8xf32>
    %8 = tpu.matmul %5, %6, %cst_6 {dimension_numbers = #tpu.dot_dimension_numbers<[1], [1], [0], [0], [0, 0, 1, 0], [], []>} : vector<8x8xf32>, vector<8x8xf32>, vector<8x8xf32> -> vector<8x8xf32>
    %cst_7 = arith.constant dense<0xFF800000> : vector<8xf32>
    %9 = vector.multi_reduction <maximumf>, %8, %cst_7 [1] : vector<8x8xf32> to vector<8xf32>
    %10 = vector.shape_cast %9 : vector<8xf32> to vector<8x1xf32>
    %11 = vector.broadcast %10 : vector<8x1xf32> to vector<8x8xf32>
    %12 = arith.subf %8, %11 : vector<8x8xf32>
    %13 = math.exp %12 : vector<8x8xf32>
    %cst_8 = arith.constant dense<0.000000e+00> : vector<8xf32>
    %14 = vector.multi_reduction <add>, %13, %cst_8 [1] : vector<8x8xf32> to vector<8xf32>
    %15 = vector.shape_cast %14 : vector<8xf32> to vector<8x1xf32>
    %16 = tpu.reciprocal %15 {approx = true} : vector<8x1xf32> -> vector<8x1xf32>
    %17 = vector.broadcast %16 : vector<8x1xf32> to vector<8x8xf32>
    %18 = arith.mulf %13, %17 : vector<8x8xf32>
    %cst_9 = arith.constant dense<0.000000e+00> : vector<8x8xf32>
    %19 = tpu.matmul %18, %7, %cst_9 {dimension_numbers = #tpu.dot_dimension_numbers<[1], [0], [0], [1], [0, 0, 1, 1], [], []>} : vector<8x8xf32>, vector<8x8xf32>, vector<8x8xf32> -> vector<8x8xf32>
    %c0_10 = arith.constant 0 : index
    %c0_11 = arith.constant 0 : index
    %20 = vector.load %arg2[%c0_10, %c0_11] : memref<32x32xf32, #tpu.memory_space<vmem>>, vector<8x32xf32>
    %cst_12 = arith.constant dense<0.000000e+00> : vector<8x32xf32>
    %21 = tpu.matmul %19, %20, %cst_12 {dimension_numbers = #tpu.dot_dimension_numbers<[1], [0], [0], [1], [0, 0, 1, 1], [], []>} : vector<8x8xf32>, vector<8x32xf32>, vector<8x32xf32> -> vector<8x32xf32>
    %22 = arith.addf %4, %21 : vector<8x32xf32>
    %23 = vector.extract_strided_slice %2 {offsets = [0, 8], sizes = [8, 8], strides = [1, 1]} : vector<16x96xf32> to vector<8x8xf32>
    %24 = vector.extract_strided_slice %2 {offsets = [0, 40], sizes = [8, 8], strides = [1, 1]} : vector<16x96xf32> to vector<8x8xf32>
    %25 = vector.extract_strided_slice %2 {offsets = [0, 72], sizes = [8, 8], strides = [1, 1]} : vector<16x96xf32> to vector<8x8xf32>
    %cst_13 = arith.constant dense<0.000000e+00> : vector<8x8xf32>
    %26 = tpu.matmul %23, %24, %cst_13 {dimension_numbers = #tpu.dot_dimension_numbers<[1], [1], [0], [0], [0, 0, 1, 0], [], []>} : vector<8x8xf32>, vector<8x8xf32>, vector<8x8xf32> -> vector<8x8xf32>
    %cst_14 = arith.constant dense<0xFF800000> : vector<8xf32>
    %27 = vector.multi_reduction <maximumf>, %26, %cst_14 [1] : vector<8x8xf32> to vector<8xf32>
    %28 = vector.shape_cast %27 : vector<8xf32> to vector<8x1xf32>
    %29 = vector.broadcast %28 : vector<8x1xf32> to vector<8x8xf32>
    %30 = arith.subf %26, %29 : vector<8x8xf32>
    %31 = math.exp %30 : vector<8x8xf32>
    %cst_15 = arith.constant dense<0.000000e+00> : vector<8xf32>
    %32 = vector.multi_reduction <add>, %31, %cst_15 [1] : vector<8x8xf32> to vector<8xf32>
    %33 = vector.shape_cast %32 : vector<8xf32> to vector<8x1xf32>
    %34 = tpu.reciprocal %33 {approx = true} : vector<8x1xf32> -> vector<8x1xf32>
    %35 = vector.broadcast %34 : vector<8x1xf32> to vector<8x8xf32>
    %36 = arith.mulf %31, %35 : vector<8x8xf32>
    %cst_16 = arith.constant dense<0.000000e+00> : vector<8x8xf32>
    %37 = tpu.matmul %36, %25, %cst_16 {dimension_numbers = #tpu.dot_dimension_numbers<[1], [0], [0], [1], [0, 0, 1, 1], [], []>} : vector<8x8xf32>, vector<8x8xf32>, vector<8x8xf32> -> vector<8x8xf32>
    %c8 = arith.constant 8 : index
    %c0_17 = arith.constant 0 : index
    %38 = vector.load %arg2[%c8, %c0_17] : memref<32x32xf32, #tpu.memory_space<vmem>>, vector<8x32xf32>
    %cst_18 = arith.constant dense<0.000000e+00> : vector<8x32xf32>
    %39 = tpu.matmul %37, %38, %cst_18 {dimension_numbers = #tpu.dot_dimension_numbers<[1], [0], [0], [1], [0, 0, 1, 1], [], []>} : vector<8x8xf32>, vector<8x32xf32>, vector<8x32xf32> -> vector<8x32xf32>
    %40 = arith.addf %22, %39 : vector<8x32xf32>
    %41 = vector.extract_strided_slice %2 {offsets = [0, 16], sizes = [8, 8], strides = [1, 1]} : vector<16x96xf32> to vector<8x8xf32>
    %42 = vector.extract_strided_slice %2 {offsets = [0, 48], sizes = [8, 8], strides = [1, 1]} : vector<16x96xf32> to vector<8x8xf32>
    %43 = vector.extract_strided_slice %2 {offsets = [0, 80], sizes = [8, 8], strides = [1, 1]} : vector<16x96xf32> to vector<8x8xf32>
    %cst_19 = arith.constant dense<0.000000e+00> : vector<8x8xf32>
    %44 = tpu.matmul %41, %42, %cst_19 {dimension_numbers = #tpu.dot_dimension_numbers<[1], [1], [0], [0], [0, 0, 1, 0], [], []>} : vector<8x8xf32>, vector<8x8xf32>, vector<8x8xf32> -> vector<8x8xf32>
    %cst_20 = arith.constant dense<0xFF800000> : vector<8xf32>
    %45 = vector.multi_reduction <maximumf>, %44, %cst_20 [1] : vector<8x8xf32> to vector<8xf32>
    %46 = vector.shape_cast %45 : vector<8xf32> to vector<8x1xf32>
    %47 = vector.broadcast %46 : vector<8x1xf32> to vector<8x8xf32>
    %48 = arith.subf %44, %47 : vector<8x8xf32>
    %49 = math.exp %48 : vector<8x8xf32>
    %cst_21 = arith.constant dense<0.000000e+00> : vector<8xf32>
    %50 = vector.multi_reduction <add>, %49, %cst_21 [1] : vector<8x8xf32> to vector<8xf32>
    %51 = vector.shape_cast %50 : vector<8xf32> to vector<8x1xf32>
    %52 = tpu.reciprocal %51 {approx = true} : vector<8x1xf32> -> vector<8x1xf32>
    %53 = vector.broadcast %52 : vector<8x1xf32> to vector<8x8xf32>
    %54 = arith.mulf %49, %53 : vector<8x8xf32>
    %cst_22 = arith.constant dense<0.000000e+00> : vector<8x8xf32>
    %55 = tpu.matmul %54, %43, %cst_22 {dimension_numbers = #tpu.dot_dimension_numbers<[1], [0], [0], [1], [0, 0, 1, 1], [], []>} : vector<8x8xf32>, vector<8x8xf32>, vector<8x8xf32> -> vector<8x8xf32>
    %c16 = arith.constant 16 : index
    %c0_23 = arith.constant 0 : index
    %56 = vector.load %arg2[%c16, %c0_23] : memref<32x32xf32, #tpu.memory_space<vmem>>, vector<8x32xf32>
    %cst_24 = arith.constant dense<0.000000e+00> : vector<8x32xf32>
    %57 = tpu.matmul %55, %56, %cst_24 {dimension_numbers = #tpu.dot_dimension_numbers<[1], [0], [0], [1], [0, 0, 1, 1], [], []>} : vector<8x8xf32>, vector<8x32xf32>, vector<8x32xf32> -> vector<8x32xf32>
    %58 = arith.addf %40, %57 : vector<8x32xf32>
    %59 = vector.extract_strided_slice %2 {offsets = [0, 24], sizes = [8, 8], strides = [1, 1]} : vector<16x96xf32> to vector<8x8xf32>
    %60 = vector.extract_strided_slice %2 {offsets = [0, 56], sizes = [8, 8], strides = [1, 1]} : vector<16x96xf32> to vector<8x8xf32>
    %61 = vector.extract_strided_slice %2 {offsets = [0, 88], sizes = [8, 8], strides = [1, 1]} : vector<16x96xf32> to vector<8x8xf32>
    %cst_25 = arith.constant dense<0.000000e+00> : vector<8x8xf32>
    %62 = tpu.matmul %59, %60, %cst_25 {dimension_numbers = #tpu.dot_dimension_numbers<[1], [1], [0], [0], [0, 0, 1, 0], [], []>} : vector<8x8xf32>, vector<8x8xf32>, vector<8x8xf32> -> vector<8x8xf32>
    %cst_26 = arith.constant dense<0xFF800000> : vector<8xf32>
    %63 = vector.multi_reduction <maximumf>, %62, %cst_26 [1] : vector<8x8xf32> to vector<8xf32>
    %64 = vector.shape_cast %63 : vector<8xf32> to vector<8x1xf32>
    %65 = vector.broadcast %64 : vector<8x1xf32> to vector<8x8xf32>
    %66 = arith.subf %62, %65 : vector<8x8xf32>
    %67 = math.exp %66 : vector<8x8xf32>
    %cst_27 = arith.constant dense<0.000000e+00> : vector<8xf32>
    %68 = vector.multi_reduction <add>, %67, %cst_27 [1] : vector<8x8xf32> to vector<8xf32>
    %69 = vector.shape_cast %68 : vector<8xf32> to vector<8x1xf32>
    %70 = tpu.reciprocal %69 {approx = true} : vector<8x1xf32> -> vector<8x1xf32>
    %71 = vector.broadcast %70 : vector<8x1xf32> to vector<8x8xf32>
    %72 = arith.mulf %67, %71 : vector<8x8xf32>
    %cst_28 = arith.constant dense<0.000000e+00> : vector<8x8xf32>
    %73 = tpu.matmul %72, %61, %cst_28 {dimension_numbers = #tpu.dot_dimension_numbers<[1], [0], [0], [1], [0, 0, 1, 1], [], []>} : vector<8x8xf32>, vector<8x8xf32>, vector<8x8xf32> -> vector<8x8xf32>
    %c24 = arith.constant 24 : index
    %c0_29 = arith.constant 0 : index
    %74 = vector.load %arg2[%c24, %c0_29] : memref<32x32xf32, #tpu.memory_space<vmem>>, vector<8x32xf32>
    %cst_30 = arith.constant dense<0.000000e+00> : vector<8x32xf32>
    %75 = tpu.matmul %73, %74, %cst_30 {dimension_numbers = #tpu.dot_dimension_numbers<[1], [0], [0], [1], [0, 0, 1, 1], [], []>} : vector<8x8xf32>, vector<8x32xf32>, vector<8x32xf32> -> vector<8x32xf32>
    %76 = arith.addf %58, %75 : vector<8x32xf32>
    %77 = vector.broadcast %3 : vector<1x32xf32> to vector<8x32xf32>
    %78 = arith.addf %76, %77 : vector<8x32xf32>
    %c0_31 = arith.constant 0 : index
    %c0_32 = arith.constant 0 : index
    %79 = vector.load %arg4[%c0_31, %c0_32] : memref<16x32xf32, #tpu.memory_space<vmem>>, vector<8x32xf32>
    tpu.vector_store %arg4[%c0_31, %c0_32], %78 {strides = array<i32>} : memref<16x32xf32, #tpu.memory_space<vmem>>, vector<8x32xf32>,
    %cst_33 = arith.constant 0.000000e+00 : f32
    %80 = vector.broadcast %cst_33 : f32 to vector<8x32xf32>
    %81 = vector.extract_strided_slice %2 {offsets = [8, 0], sizes = [8, 8], strides = [1, 1]} : vector<16x96xf32> to vector<8x8xf32>
    %82 = vector.extract_strided_slice %2 {offsets = [8, 32], sizes = [8, 8], strides = [1, 1]} : vector<16x96xf32> to vector<8x8xf32>
    %83 = vector.extract_strided_slice %2 {offsets = [8, 64], sizes = [8, 8], strides = [1, 1]} : vector<16x96xf32> to vector<8x8xf32>
    %cst_34 = arith.constant dense<0.000000e+00> : vector<8x8xf32>
    %84 = tpu.matmul %81, %82, %cst_34 {dimension_numbers = #tpu.dot_dimension_numbers<[1], [1], [0], [0], [0, 0, 1, 0], [], []>} : vector<8x8xf32>, vector<8x8xf32>, vector<8x8xf32> -> vector<8x8xf32>
    %cst_35 = arith.constant dense<0xFF800000> : vector<8xf32>
    %85 = vector.multi_reduction <maximumf>, %84, %cst_35 [1] : vector<8x8xf32> to vector<8xf32>
    %86 = vector.shape_cast %85 : vector<8xf32> to vector<8x1xf32>
    %87 = vector.broadcast %86 : vector<8x1xf32> to vector<8x8xf32>
    %88 = arith.subf %84, %87 : vector<8x8xf32>
    %89 = math.exp %88 : vector<8x8xf32>
    %cst_36 = arith.constant dense<0.000000e+00> : vector<8xf32>
    %90 = vector.multi_reduction <add>, %89, %cst_36 [1] : vector<8x8xf32> to vector<8xf32>
    %91 = vector.shape_cast %90 : vector<8xf32> to vector<8x1xf32>
    %92 = tpu.reciprocal %91 {approx = true} : vector<8x1xf32> -> vector<8x1xf32>
    %93 = vector.broadcast %92 : vector<8x1xf32> to vector<8x8xf32>
    %94 = arith.mulf %89, %93 : vector<8x8xf32>
    %cst_37 = arith.constant dense<0.000000e+00> : vector<8x8xf32>
    %95 = tpu.matmul %94, %83, %cst_37 {dimension_numbers = #tpu.dot_dimension_numbers<[1], [0], [0], [1], [0, 0, 1, 1], [], []>} : vector<8x8xf32>, vector<8x8xf32>, vector<8x8xf32> -> vector<8x8xf32>
    %c0_38 = arith.constant 0 : index
    %c0_39 = arith.constant 0 : index
    %96 = vector.load %arg2[%c0_38, %c0_39] : memref<32x32xf32, #tpu.memory_space<vmem>>, vector<8x32xf32>
    %cst_40 = arith.constant dense<0.000000e+00> : vector<8x32xf32>
    %97 = tpu.matmul %95, %96, %cst_40 {dimension_numbers = #tpu.dot_dimension_numbers<[1], [0], [0], [1], [0, 0, 1, 1], [], []>} : vector<8x8xf32>, vector<8x32xf32>, vector<8x32xf32> -> vector<8x32xf32>
    %98 = arith.addf %80, %97 : vector<8x32xf32>
    %99 = vector.extract_strided_slice %2 {offsets = [8, 8], sizes = [8, 8], strides = [1, 1]} : vector<16x96xf32> to vector<8x8xf32>
    %100 = vector.extract_strided_slice %2 {offsets = [8, 40], sizes = [8, 8], strides = [1, 1]} : vector<16x96xf32> to vector<8x8xf32>
    %101 = vector.extract_strided_slice %2 {offsets = [8, 72], sizes = [8, 8], strides = [1, 1]} : vector<16x96xf32> to vector<8x8xf32>
    %cst_41 = arith.constant dense<0.000000e+00> : vector<8x8xf32>
    %102 = tpu.matmul %99, %100, %cst_41 {dimension_numbers = #tpu.dot_dimension_numbers<[1], [1], [0], [0], [0, 0, 1, 0], [], []>} : vector<8x8xf32>, vector<8x8xf32>, vector<8x8xf32> -> vector<8x8xf32>
    %cst_42 = arith.constant dense<0xFF800000> : vector<8xf32>
    %103 = vector.multi_reduction <maximumf>, %102, %cst_42 [1] : vector<8x8xf32> to vector<8xf32>
    %104 = vector.shape_cast %103 : vector<8xf32> to vector<8x1xf32>
    %105 = vector.broadcast %104 : vector<8x1xf32> to vector<8x8xf32>
    %106 = arith.subf %102, %105 : vector<8x8xf32>
    %107 = math.exp %106 : vector<8x8xf32>
    %cst_43 = arith.constant dense<0.000000e+00> : vector<8xf32>
    %108 = vector.multi_reduction <add>, %107, %cst_43 [1] : vector<8x8xf32> to vector<8xf32>
    %109 = vector.shape_cast %108 : vector<8xf32> to vector<8x1xf32>
    %110 = tpu.reciprocal %109 {approx = true} : vector<8x1xf32> -> vector<8x1xf32>
    %111 = vector.broadcast %110 : vector<8x1xf32> to vector<8x8xf32>
    %112 = arith.mulf %107, %111 : vector<8x8xf32>
    %cst_44 = arith.constant dense<0.000000e+00> : vector<8x8xf32>
    %113 = tpu.matmul %112, %101, %cst_44 {dimension_numbers = #tpu.dot_dimension_numbers<[1], [0], [0], [1], [0, 0, 1, 1], [], []>} : vector<8x8xf32>, vector<8x8xf32>, vector<8x8xf32> -> vector<8x8xf32>
    %c8_45 = arith.constant 8 : index
    %c0_46 = arith.constant 0 : index
    %114 = vector.load %arg2[%c8_45, %c0_46] : memref<32x32xf32, #tpu.memory_space<vmem>>, vector<8x32xf32>
    %cst_47 = arith.constant dense<0.000000e+00> : vector<8x32xf32>
    %115 = tpu.matmul %113, %114, %cst_47 {dimension_numbers = #tpu.dot_dimension_numbers<[1], [0], [0], [1], [0, 0, 1, 1], [], []>} : vector<8x8xf32>, vector<8x32xf32>, vector<8x32xf32> -> vector<8x32xf32>
    %116 = arith.addf %98, %115 : vector<8x32xf32>
    %117 = vector.extract_strided_slice %2 {offsets = [8, 16], sizes = [8, 8], strides = [1, 1]} : vector<16x96xf32> to vector<8x8xf32>
    %118 = vector.extract_strided_slice %2 {offsets = [8, 48], sizes = [8, 8], strides = [1, 1]} : vector<16x96xf32> to vector<8x8xf32>
    %119 = vector.extract_strided_slice %2 {offsets = [8, 80], sizes = [8, 8], strides = [1, 1]} : vector<16x96xf32> to vector<8x8xf32>
    %cst_48 = arith.constant dense<0.000000e+00> : vector<8x8xf32>
    %120 = tpu.matmul %117, %118, %cst_48 {dimension_numbers = #tpu.dot_dimension_numbers<[1], [1], [0], [0], [0, 0, 1, 0], [], []>} : vector<8x8xf32>, vector<8x8xf32>, vector<8x8xf32> -> vector<8x8xf32>
    %cst_49 = arith.constant dense<0xFF800000> : vector<8xf32>
    %121 = vector.multi_reduction <maximumf>, %120, %cst_49 [1] : vector<8x8xf32> to vector<8xf32>
    %122 = vector.shape_cast %121 : vector<8xf32> to vector<8x1xf32>
    %123 = vector.broadcast %122 : vector<8x1xf32> to vector<8x8xf32>
    %124 = arith.subf %120, %123 : vector<8x8xf32>
    %125 = math.exp %124 : vector<8x8xf32>
    %cst_50 = arith.constant dense<0.000000e+00> : vector<8xf32>
    %126 = vector.multi_reduction <add>, %125, %cst_50 [1] : vector<8x8xf32> to vector<8xf32>
    %127 = vector.shape_cast %126 : vector<8xf32> to vector<8x1xf32>
    %128 = tpu.reciprocal %127 {approx = true} : vector<8x1xf32> -> vector<8x1xf32>
    %129 = vector.broadcast %128 : vector<8x1xf32> to vector<8x8xf32>
    %130 = arith.mulf %125, %129 : vector<8x8xf32>
    %cst_51 = arith.constant dense<0.000000e+00> : vector<8x8xf32>
    %131 = tpu.matmul %130, %119, %cst_51 {dimension_numbers = #tpu.dot_dimension_numbers<[1], [0], [0], [1], [0, 0, 1, 1], [], []>} : vector<8x8xf32>, vector<8x8xf32>, vector<8x8xf32> -> vector<8x8xf32>
    %c16_52 = arith.constant 16 : index
    %c0_53 = arith.constant 0 : index
    %132 = vector.load %arg2[%c16_52, %c0_53] : memref<32x32xf32, #tpu.memory_space<vmem>>, vector<8x32xf32>
    %cst_54 = arith.constant dense<0.000000e+00> : vector<8x32xf32>
    %133 = tpu.matmul %131, %132, %cst_54 {dimension_numbers = #tpu.dot_dimension_numbers<[1], [0], [0], [1], [0, 0, 1, 1], [], []>} : vector<8x8xf32>, vector<8x32xf32>, vector<8x32xf32> -> vector<8x32xf32>
    %134 = arith.addf %116, %133 : vector<8x32xf32>
    %135 = vector.extract_strided_slice %2 {offsets = [8, 24], sizes = [8, 8], strides = [1, 1]} : vector<16x96xf32> to vector<8x8xf32>
    %136 = vector.extract_strided_slice %2 {offsets = [8, 56], sizes = [8, 8], strides = [1, 1]} : vector<16x96xf32> to vector<8x8xf32>
    %137 = vector.extract_strided_slice %2 {offsets = [8, 88], sizes = [8, 8], strides = [1, 1]} : vector<16x96xf32> to vector<8x8xf32>
    %cst_55 = arith.constant dense<0.000000e+00> : vector<8x8xf32>
    %138 = tpu.matmul %135, %136, %cst_55 {dimension_numbers = #tpu.dot_dimension_numbers<[1], [1], [0], [0], [0, 0, 1, 0], [], []>} : vector<8x8xf32>, vector<8x8xf32>, vector<8x8xf32> -> vector<8x8xf32>
    %cst_56 = arith.constant dense<0xFF800000> : vector<8xf32>
    %139 = vector.multi_reduction <maximumf>, %138, %cst_56 [1] : vector<8x8xf32> to vector<8xf32>
    %140 = vector.shape_cast %139 : vector<8xf32> to vector<8x1xf32>
    %141 = vector.broadcast %140 : vector<8x1xf32> to vector<8x8xf32>
    %142 = arith.subf %138, %141 : vector<8x8xf32>
    %143 = math.exp %142 : vector<8x8xf32>
    %cst_57 = arith.constant dense<0.000000e+00> : vector<8xf32>
    %144 = vector.multi_reduction <add>, %143, %cst_57 [1] : vector<8x8xf32> to vector<8xf32>
    %145 = vector.shape_cast %144 : vector<8xf32> to vector<8x1xf32>
    %146 = tpu.reciprocal %145 {approx = true} : vector<8x1xf32> -> vector<8x1xf32>
    %147 = vector.broadcast %146 : vector<8x1xf32> to vector<8x8xf32>
    %148 = arith.mulf %143, %147 : vector<8x8xf32>
    %cst_58 = arith.constant dense<0.000000e+00> : vector<8x8xf32>
    %149 = tpu.matmul %148, %137, %cst_58 {dimension_numbers = #tpu.dot_dimension_numbers<[1], [0], [0], [1], [0, 0, 1, 1], [], []>} : vector<8x8xf32>, vector<8x8xf32>, vector<8x8xf32> -> vector<8x8xf32>
    %c24_59 = arith.constant 24 : index
    %c0_60 = arith.constant 0 : index
    %150 = vector.load %arg2[%c24_59, %c0_60] : memref<32x32xf32, #tpu.memory_space<vmem>>, vector<8x32xf32>
    %cst_61 = arith.constant dense<0.000000e+00> : vector<8x32xf32>
    %151 = tpu.matmul %149, %150, %cst_61 {dimension_numbers = #tpu.dot_dimension_numbers<[1], [0], [0], [1], [0, 0, 1, 1], [], []>} : vector<8x8xf32>, vector<8x32xf32>, vector<8x32xf32> -> vector<8x32xf32>
    %152 = arith.addf %134, %151 : vector<8x32xf32>
    %153 = vector.broadcast %3 : vector<1x32xf32> to vector<8x32xf32>
    %154 = arith.addf %152, %153 : vector<8x32xf32>
    %c8_62 = arith.constant 8 : index
    %c0_63 = arith.constant 0 : index
    %155 = vector.load %arg4[%c8_62, %c0_63] : memref<16x32xf32, #tpu.memory_space<vmem>>, vector<8x32xf32>
    tpu.vector_store %arg4[%c8_62, %c0_63], %154 {strides = array<i32>} : memref<16x32xf32, #tpu.memory_space<vmem>>, vector<8x32xf32>,
    return
  }
}

</mosaic_0001>

<bundles_post_ra>
// kernel: attention_forward.1
= control target key start
LH: loop header
LB: loop body
LE: loop exit
PB: predicated region body
PF: predicated region fallthrough
CT: control target
= control target key end

     0   :  { %9 = vsyncpa [#allocation3], 0  ;;  %s2772_s0 = inlined_call_operand.hbm [shape: f32[16,32], index: 0, kind: input, shape index: {}]   ;;  %s2773_s1 = inlined_call_operand.hbm [shape: f32[32,96], index: 1, kind: input, shape index: {}]   ;;  %s2774_s2 = inlined_call_operand.hbm [shape: f32[32,32], index: 2, kind: input, shape index: {}]   ;;  %s2775_s3 = inlined_call_operand.vmem [shape: f32[1,32], index: 3, kind: input, shape index: {}]   ;;  %s2776_s4 = inlined_call_operand.hbm [shape: f32[16,32], index: 4, kind: output, shape index: {}]  }
   0x1   :  { %10 = vsyncpa [#allocation6], 0 }
   0x2   :  { %11 = vsyncpa [#allocation4], 0  ;;  %s2464_s15 = smov [#allocation5]   ;;  %s2465_s17 = smov [#allocation2]  }
   0x3   :  { %s29_s16 = sshll.u32 %s2464_s15, 4  ;;  %s17_s18 = sshll.u32 %s2465_s17, 4  ;;  %s30_s16 = int_to_ptr.vmem [resolvable:$true] %s29_s16  ;;  %s2508_s18 = int_to_ptr.vmem [resolvable:$true] %s17_s18 }
   0x4   :  { %s2370_s21 = scalar_lea.hbm %s2773_s1, 512 }
   0x5   :  { %p2371_p0 = scmp.ne.s32.totalorder %s2773_s1, %s2370_s21  ;;  %p2374_p1 = scmp.lt.u32.totalorder %s2370_s21, %s2773_s1 }
   0x7   :  { %p2376_p2 = pnand %p2374_p1, %p2371_p0 }
   0x9   :  { %2379 = shalt.err (!%p2376_p2)
}
   0xa   :  { %s2380_s26 = scalar_lea.vmem %s30_s16, 512  ;;  %p2385_p4 = scmp.lt.s32.totalorder %s30_s16, %s30_s16 }
   0xb   :  { %p2381_p3 = scmp.ne.s32.totalorder %s30_s16, %s2380_s26  ;;  %p2386_p5 = scmp.lt.s32.totalorder %s2380_s26, %s2380_s26 }
   0xd   :  { %p2387_p6 = por %p2386_p5, %p2385_p4 }
   0xf   :  { %p2388_p7 = pnand %p2387_p6, %p2381_p3 }
  0x11   :  { %2391 = shalt.err (!%p2388_p7)
}
  0x12   :  { %s2466_s27 = smov 128   ;;  %s2467_s28 = smov 8  }
  0x13   :  { %35 = dma.hbm_to_vmem [thread:$0]  %s2773_s1, 512, %s30_s16, [#allocation6], %s2466_s27, %s2466_s27, %s2467_s28  }
  0x14   :  { %s2392_s7 = scalar_lea.hbm %s2772_s0, 256 }
  0x15   :  { %p2393_p8 = scmp.ne.s32.totalorder %s2772_s0, %s2392_s7  ;;  %p2396_p9 = scmp.lt.u32.totalorder %s2392_s7, %s2772_s0 }
  0x17   :  { %p2398_p10 = pnand %p2396_p9, %p2393_p8 }
  0x19   :  { %2401 = shalt.err (!%p2398_p10)
}
  0x1a   :  { %s2402_s12 = scalar_lea.vmem %s2508_s18, 256  ;;  %p2407_p12 = scmp.lt.s32.totalorder %s2508_s18, %s2508_s18 }
  0x1b   :  { %p2403_p11 = scmp.ne.s32.totalorder %s2508_s18, %s2402_s12  ;;  %p2408_p13 = scmp.lt.s32.totalorder %s2402_s12, %s2402_s12 }
  0x1d   :  { %p2409_p0 = por %p2408_p13, %p2407_p12 }
  0x1f   :  { %p2410_p1 = pnand %p2409_p0, %p2403_p11 }
  0x21   :  { %2413 = shalt.err (!%p2410_p1)
}
  0x22   :  { %23 = dma.hbm_to_vmem [thread:$0]  %s2772_s0, 256, %s2508_s18, [#allocation3], %s2466_s27, %s2466_s27, %s2467_s28  }
  0x23   :  { %s2468_s14 = smov [#allocation7]   ;;  %s2414_s19 = scalar_lea.hbm %s2774_s2, 512 }
  0x24   :  { %s41_s15 = sshll.u32 %s2468_s14, 4  ;;  %p2415_p2 = scmp.ne.s32.totalorder %s2774_s2, %s2414_s19  ;;  %s42_s15 = int_to_ptr.vmem [resolvable:$true] %s41_s15 }
  0x25   :  { %p2418_p3 = scmp.lt.u32.totalorder %s2414_s19, %s2774_s2 }
  0x27   :  { %p2420_p4 = pnand %p2418_p3, %p2415_p2 }
  0x29   :  { %2423 = shalt.err (!%p2420_p4)
}
  0x2a   :  { %s2424_s24 = scalar_lea.vmem %s42_s15, 512  ;;  %p2429_p6 = scmp.lt.s32.totalorder %s42_s15, %s42_s15 }
  0x2b   :  { %p2425_p5 = scmp.ne.s32.totalorder %s42_s15, %s2424_s24  ;;  %p2430_p7 = scmp.lt.s32.totalorder %s2424_s24, %s2424_s24 }
  0x2d   :  { %p2431_p8 = por %p2430_p7, %p2429_p6 }
  0x2f   :  { %p2432_p9 = pnand %p2431_p8, %p2425_p5 }
  0x31   :  { %2435 = shalt.err (!%p2432_p9)
}
  0x32   :  { %47 = dma.hbm_to_vmem [thread:$0]  %s2774_s2, 512, %s42_s15, [#allocation6], %s2466_s27, %s2466_s27, %s2467_s28  }
  0x33   :  { %2458 = dma.done.wait [#allocation3], 256  }
  0x34   :  { %2459 = vsyncadd [#allocation3], 4294967040 }
  0x35   :  { %2460 = dma.done.wait [#allocation6], 1024  }
  0x36   :  { %2461 = vsyncadd [#allocation6], 4294966272  ;;  %vm65_vm0 = vcmask 261120   ;;  %v61_v0 = vld [vmem:[#allocation5] sm:$0xff]  ;;  %v62_v1 = vld [vmem:[#allocation5 + $0x8] sm:$0xff]  ;;  %v2469_v8 = vmov 0.0  }
  0x37   :  { %v63_v2 = vld [vmem:[#allocation5 + $0x10] sm:$0xff]  ;;  %v2311_v3 = vpack.c.bf16 %v62_v1, %v61_v0  ;;  %v64_v4 = vld [vmem:[#allocation5 + $0x18] sm:$0xff]  ;;  %2191 = vmatprep.subr.mxu1 %v2469_v8  ;;  %vm2470_vm1 = vmmov 0   ;;  %s2471_s2 = smov 120   ;;  %s2472_s25 = smov 96   ;;  %vm151_vm2 = vcmask 64512  }
  0x38   :  { %v59_v5 = vld [vmem:[#allocation2] sm:$0xff]  ;;  %v2315_v6 = vpack.c.bf16 %v64_v4, %v63_v2  ;;  %v60_v7 = vld [vmem:[#allocation2 + $0x8] sm:$0xff]  ;;  %2193 = vmatprep.mubr.msk.f32.mxu1 %vm2470_vm1, %v2469_v8  ;;  %s2473_s26 = smov 88   ;;  %s2474_s29 = smov 56   ;;  %v2601_v30 = vld [vmem:[#allocation7 + $0x8] sm:$0xff] }
  0x39   :  { %2188 = vmatprep.mubr.msk.f32.mxu0 %vm65_vm0, %v59_v5  ;;  %2312 = vmatprep.subr.bf16.mxu0 %v2311_v3  ;;  %s2475_s30 = smov 64   ;;  %s2476_s5 = smov 80   ;;  %v2613_v39 = vld [vmem:[#allocation7] sm:$0xff]  ;;  %v2647_v1 = vld [vmem:[#allocation7 + $0x10] sm:$0xff] }
  0x3a   :  { %2314 = vmatpush3.bf16.msra.mxu0 %v2311_v3  ;;  %s2477_s6 = smov 112   ;;  %s2478_s7 = smov 72  }
  0x3b   :  { %2316 = vmatprep.subr.bf16.mxu0 %v2315_v6  ;;  %s2479_s8 = smov 104   ;;  %s2480_s9 = smov 48  }
  0x3c   :  { %s2481_s10 = smov 40  }
  0x3e   :  { %2318 = vmatpush3.bf16.msra.mxu0 %v2315_v6 }
  0x3f   :  { %2201 = vmatprep.subr.mxu0 %v2469_v8 }
  0x41   :  { %2189 = vmatmul.mubr.msk.f32.vlgmr.msra.gmra.mrb[0].mxu0 %vm65_vm0, %v60_v7 }
  0x42   :  { %2203 = vmatprep.mubr.msk.f32.mxu0 %vm2470_vm1, %v2469_v8 }
 0x114   :  { %v2568_v9 = vpop.f32.mrb[0].mxu0 }
 0x115   :  { %v2570_v10 = vpop.f32.mrb[1].mxu0 }
 0x116   :  { %314 = vrot.lane.b32.xlu1 %v2570_v10, %s2471_s2  ;;  %149 = vrot.lane.b32.xlu0 %v2570_v10, %s2472_s25 }
 0x11a   :  { %316 = vrot.lane.b32.xlu0 %v2570_v10, %s2473_s26 }
 0x188   :  { %v150_v11 = vpop.permute.xlu0 %149  ;;  %v315_v13 = vpop.permute.xlu1 %314 }
 0x189   :  { %2192 = vmatpush3.xpose.msk.msra.mxu1 %vm151_vm2, %v150_v11 }
 0x18a   :  { %2196 = vmatprep.subr.mxu1 %v2469_v8 }
 0x18c   :  { %2194 = vmatmul.mubr.msk.f32.vlgmr.msra.gmra.mrb[0].mxu1 %vm151_vm2, %v2570_v10  ;;  %v317_v12 = vpop.permute.xlu0 %316 }
 0x18d   :  { %2202 = vmatpush3.xpose.msk.msra.mxu0 %vm151_vm2, %v317_v12  ;;  %2198 = vmatprep.mubr.msk.f32.mxu1 %vm2470_vm1, %v2469_v8 }
 0x18e   :  { %2211 = vmatprep.subr.mxu0 %v2469_v8 }
 0x190   :  { %2204 = vmatmul.mubr.msk.f32.vlgmr.msra.gmra.mrb[2].mxu0 %vm151_vm2, %v315_v13 }
 0x191   :  { %2213 = vmatprep.mubr.msk.f32.mxu0 %vm2470_vm1, %v2469_v8  ;;  %2212 = vmatpush3.msra.mxu0 %v2601_v30 }
 0x192   :  { %2221 = vmatprep.subr.mxu0 %v2469_v8 }
 0x25f   :  { %v222_v14 = vpop.f32.mrb[0].mxu1 }
 0x260   :  { %v2195_v15 = vpop.f32.mrb[1].mxu1  ;;  %v226_v16 = vsel %vm151_vm2, %v222_v14, -inf }
 0x261   :  { %227 = vmax.xlane.f32.xlu1 %v226_v16 }
 0x263   :  { %v388_v17 = vpop.f32.mrb[2].mxu0 }
 0x264   :  { %v2205_v18 = vpop.f32.mrb[3].mxu0  ;;  %v392_v19 = vsel %vm151_vm2, %v388_v17, -inf }
 0x265   :  { %393 = vmax.xlane.f32.xlu0 %v392_v19 }
 0x2ee   :  { %v228_v20 = vpop.xlane.xlu1 %227 }
 0x2ef   :  { %v229_v21 = vsub.f32 %v222_v14, %v228_v20 }
 0x2f1   :  { %v230_v22 = vmul.f32 1.442695, %v229_v21 }
 0x2f2   :  { %v394_v23 = vpop.xlane.xlu0 %393 }
 0x2f3   :  { %2338 = vpow2.f32 %v230_v22  ;;  %v395_v24 = vsub.f32 %v388_v17, %v394_v23 }
 0x2f5   :  { %v396_v25 = vmul.f32 1.442695, %v395_v24  ;;  %v2679_v24 = vld [vmem:[#allocation7 + $0x18] sm:$0xff] }
 0x2f7   :  { %2340 = vpow2.f32 %v396_v25 }
 0x2fd   :  { %v2339_v26 = vpop.eup %2338 }
 0x2fe   :  { %v232_v27 = vsel %vm151_vm2, %v2339_v26, 0.0 }
 0x2ff   :  { %233 = vadd.xlane.f32.xlu0 %v232_v27 }
 0x301   :  { %v2341_v28 = vpop.eup %2340 }
 0x302   :  { %v398_v29 = vsel %vm151_vm2, %v2341_v28, 0.0 }
 0x303   :  { %399 = vadd.xlane.f32.xlu1 %v398_v29 }
 0x314   :  { %403 = vrot.lane.b32.xlu1 %v2570_v10, %s2474_s29 }
 0x315   :  { %237 = vrot.lane.b32.xlu0 %v2570_v10, %s2475_s30 }
 0x318   :  { %628 = vrot.lane.b32.xlu1 %v2570_v10, %s2476_s5 }
 0x319   :  { %626 = vrot.lane.b32.xlu0 %v2570_v10, %s2477_s6 }
 0x38c   :  { %v234_v31 = vpop.xlane.xlu0 %233 }
 0x38d   :  { %2342 = vrcp.f32 %v234_v31 }
 0x390   :  { %v400_v32 = vpop.xlane.xlu1 %399  ;;  %v238_v33 = vpop.permute.xlu0 %237 }
 0x391   :  { %2344 = vrcp.f32 %v400_v32  ;;  %2197 = vmatpush3.msra.mxu1 %v238_v33 }
 0x392   :  { %2206 = vmatprep.subr.mxu1 %v2469_v8 }
 0x394   :  { %v404_v36 = vpop.permute.xlu1 %403  ;;  %v627_v45 = vpop.permute.xlu0 %626 }
 0x397   :  { %v2343_v34 = vpop.eup %2342 }
 0x398   :  { %v236_v35 = vmul.f32 %v2343_v34, %v2339_v26  ;;  %v629_v43 = vpop.permute.xlu1 %628 }
 0x39a   :  { %2199 = vmatmul.mubr.msk.f32.vlgmr.msra.gmra.mrb[2].mxu1 %vm151_vm2, %v236_v35 }
 0x39b   :  { %v2345_v37 = vpop.eup %2344  ;;  %2207 = vmatpush3.msra.mxu1 %v404_v36  ;;  %2208 = vmatprep.mubr.msk.f32.mxu1 %vm2470_vm1, %v2469_v8 }
 0x39c   :  { %v402_v38 = vmul.f32 %v2345_v37, %v2341_v28  ;;  %2216 = vmatprep.subr.mxu1 %v2469_v8 }
 0x39e   :  { %2209 = vmatmul.mubr.msk.f32.vlgmr.msra.gmra.mrb[4].mxu1 %vm151_vm2, %v402_v38 }
 0x39f   :  { %2218 = vmatprep.mubr.msk.f32.mxu1 %vm2470_vm1, %v2469_v8  ;;  %2217 = vmatpush3.msra.mxu1 %v2613_v39 }
 0x3a0   :  { %2226 = vmatprep.subr.mxu1 %v2469_v8 }
 0x46d   :  { %v309_v40 = vpop.f32.mrb[2].mxu1 }
 0x46e   :  { %v2200_v41 = vpop.f32.mrb[3].mxu1  ;;  %2219 = vmatmul.mubr.msk.f32.vlgmr.msra.gmra.mrb[6].mxu1 %vm151_vm2, %v309_v40 }
 0x46f   :  { %2228 = vmatprep.mubr.msk.f32.mxu1 %vm2470_vm1, %v2469_v8 }
 0x471   :  { %v475_v42 = vpop.f32.mrb[4].mxu1 }
 0x472   :  { %v2210_v44 = vpop.f32.mrb[5].mxu1  ;;  %2214 = vmatmul.mubr.msk.f32.vlgmr.msra.gmra.mrb[4].mxu0 %vm151_vm2, %v475_v42 }
 0x473   :  { %2222 = vmatpush3.xpose.msk.msra.mxu0 %vm151_vm2, %v629_v43  ;;  %2223 = vmatprep.mubr.msk.f32.mxu0 %vm2470_vm1, %v2469_v8 }
 0x474   :  { %2231 = vmatprep.subr.mxu0 %v2469_v8 }
 0x476   :  { %2224 = vmatmul.mubr.msk.f32.vlgmr.msra.gmra.mrb[6].mxu0 %vm151_vm2, %v627_v45  ;;  %v2702_v45 = vld [vmem:[%s2775_s3] ss:$0 sm:$0xff]  ;;  %s2482_s3 = smov [#allocation8]  }
 0x477   :  { %2233 = vmatprep.mubr.msk.f32.mxu0 %vm2470_vm1, %v2469_v8  ;;  %2232 = vmatpush3.msra.mxu0 %v2647_v1  ;;  %s2078_s1 = sshll.u32 %s2482_s3, 4  ;;  %s2079_s1 = int_to_ptr.vmem [resolvable:$true] %s2078_s1 }
 0x478   :  { %2241 = vmatprep.subr.mxu0 %v2469_v8  ;;  %s2436_s13 = scalar_lea.vmem %s2079_s1, 256  ;;  %p2441_p11 = scmp.lt.s32.totalorder %s2079_s1, %s2079_s1 }
 0x479   :  { %p2437_p10 = scmp.ne.s32.totalorder %s2079_s1, %s2436_s13  ;;  %p2442_p12 = scmp.lt.s32.totalorder %s2436_s13, %s2436_s13 }
 0x47b   :  { %p2443_p13 = por %p2442_p12, %p2441_p11 }
 0x47d   :  { %p2444_p0 = pnand %p2443_p13, %p2437_p10 }
 0x541   :  { %v622_v46 = vpop.f32.mrb[6].mxu1 }
 0x542   :  { %v2220_v47 = vpop.f32.mrb[7].mxu1 }
 0x545   :  { %v549_v48 = vpop.f32.mrb[4].mxu0 }
 0x546   :  { %v623_v49 = vadd.f32 %v622_v46, %v549_v48  ;;  %v2215_v50 = vpop.f32.mrb[5].mxu0 }
 0x549   :  { %v700_v51 = vpop.f32.mrb[6].mxu0 }
 0x54a   :  { %v2225_v52 = vpop.f32.mrb[7].mxu0  ;;  %v704_v53 = vsel %vm151_vm2, %v700_v51, -inf }
 0x54b   :  { %705 = vmax.xlane.f32.xlu1 %v704_v53 }
 0x55c   :  { %868 = vrot.lane.b32.xlu1 %v2570_v10, %s2478_s7 }
 0x560   :  { %866 = vrot.lane.b32.xlu1 %v2570_v10, %s2479_s8 }
 0x564   :  { %1115 = vrot.lane.b32.xlu1 %v2568_v9, %s2472_s25 }
 0x5d8   :  { %v706_v54 = vpop.xlane.xlu1 %705 }
 0x5d9   :  { %v707_v55 = vsub.f32 %v700_v51, %v706_v54 }
 0x5db   :  { %v708_v56 = vmul.f32 1.442695, %v707_v55 }
 0x5dc   :  { %v869_v62 = vpop.permute.xlu1 %868 }
 0x5dd   :  { %2346 = vpow2.f32 %v708_v56 }
 0x5e0   :  { %v867_v0 = vpop.permute.xlu1 %866 }
 0x5e4   :  { %v1116_v18 = vpop.permute.xlu1 %1115 }
 0x5e7   :  { %v2347_v57 = vpop.eup %2346 }
 0x5e8   :  { %v710_v58 = vsel %vm151_vm2, %v2347_v57, 0.0 }
 0x5e9   :  { %711 = vadd.xlane.f32.xlu0 %v710_v58 }
 0x5ff   :  { %715 = vrot.lane.b32.xlu0 %v2570_v10, %s2480_s9 }
 0x676   :  { %v712_v59 = vpop.xlane.xlu0 %711 }
 0x677   :  { %2348 = vrcp.f32 %v712_v59 }
 0x67a   :  { %v716_v60 = vpop.permute.xlu0 %715 }
 0x67b   :  { %2227 = vmatpush3.msra.mxu1 %v716_v60 }
 0x67c   :  { %2236 = vmatprep.subr.mxu1 %v2469_v8 }
 0x681   :  { %v2349_v61 = vpop.eup %2348 }
 0x682   :  { %v714_v63 = vmul.f32 %v2349_v61, %v2347_v57 }
 0x684   :  { %2229 = vmatmul.mubr.msk.f32.vlgmr.msra.gmra.mrb[8].mxu1 %vm151_vm2, %v714_v63 }
 0x685   :  { %2237 = vmatpush3.xpose.msk.msra.mxu1 %vm151_vm2, %v869_v62  ;;  %2238 = vmatprep.mubr.msk.f32.mxu1 %vm2470_vm1, %v2469_v8 }
 0x686   :  { %2246 = vmatprep.subr.mxu1 %v2469_v8 }
 0x688   :  { %2239 = vmatmul.mubr.msk.f32.vlgmr.msra.gmra.mrb[10].mxu1 %vm151_vm2, %v867_v0 }
 0x689   :  { %2248 = vmatprep.mubr.msk.f32.mxu1 %vm2470_vm1, %v2469_v8  ;;  %2247 = vmatpush3.msra.mxu1 %v2679_v24 }
 0x68a   :  { %2256 = vmatprep.subr.mxu1 %v2469_v8 }
 0x757   :  { %v787_v2 = vpop.f32.mrb[8].mxu1 }
 0x758   :  { %v2230_v3 = vpop.f32.mrb[9].mxu1  ;;  %2234 = vmatmul.mubr.msk.f32.vlgmr.msra.gmra.mrb[8].mxu0 %vm151_vm2, %v787_v2 }
 0x759   :  { %2243 = vmatprep.mubr.msk.f32.mxu0 %vm2470_vm1, %v2469_v8 }
 0x75b   :  { %v940_v4 = vpop.f32.mrb[10].mxu1 }
 0x75c   :  { %v2240_v5 = vpop.f32.mrb[11].mxu1  ;;  %v944_v6 = vsel %vm151_vm2, %v940_v4, -inf }
 0x75d   :  { %945 = vmax.xlane.f32.xlu0 %v944_v6 }
 0x773   :  { %955 = vrot.lane.b32.xlu0 %v2570_v10, %s2481_s10 }
 0x777   :  { %1281 = vrot.lane.b32.xlu0 %v2568_v9, %s2473_s26 }
 0x7ea   :  { %v946_v7 = vpop.xlane.xlu0 %945 }
 0x7eb   :  { %v947_v11 = vsub.f32 %v940_v4, %v946_v7 }
 0x7ed   :  { %v948_v12 = vmul.f32 1.442695, %v947_v11 }
 0x7ee   :  { %v956_v13 = vpop.permute.xlu0 %955 }
 0x7ef   :  { %2350 = vpow2.f32 %v948_v12  ;;  %2242 = vmatpush3.msra.mxu0 %v956_v13 }
 0x7f0   :  { %2251 = vmatprep.subr.mxu0 %v2469_v8 }
 0x7f2   :  { %v1282_v22 = vpop.permute.xlu0 %1281 }
 0x7f9   :  { %v2351_v14 = vpop.eup %2350 }
 0x7fa   :  { %v950_v15 = vsel %vm151_vm2, %v2351_v14, 0.0 }
 0x7fb   :  { %951 = vadd.xlane.f32.xlu1 %v950_v15 }
 0x80c   :  { %1279 = vrot.lane.b32.xlu1 %v2568_v9, %s2471_s2 }
 0x82b   :  { %v861_v16 = vpop.f32.mrb[8].mxu0 }
 0x82c   :  { %v865_v10 = vadd.f32 %v861_v16, %v623_v49  ;;  %v2235_v17 = vpop.f32.mrb[9].mxu0 }
 0x888   :  { %v952_v19 = vpop.xlane.xlu1 %951 }
 0x889   :  { %2352 = vrcp.f32 %v952_v19 }
 0x88c   :  { %v1280_v23 = vpop.permute.xlu1 %1279 }
 0x893   :  { %v2353_v20 = vpop.eup %2352 }
 0x894   :  { %v954_v21 = vmul.f32 %v2353_v20, %v2351_v14 }
 0x896   :  { %2244 = vmatmul.mubr.msk.f32.vlgmr.msra.gmra.mrb[10].mxu0 %vm151_vm2, %v954_v21 }
 0x897   :  { %2252 = vmatpush3.xpose.msk.msra.mxu0 %vm151_vm2, %v1116_v18  ;;  %2253 = vmatprep.mubr.msk.f32.mxu0 %vm2470_vm1, %v2469_v8 }
 0x898   :  { %2261 = vmatprep.subr.mxu0 %v2469_v8 }
 0x89a   :  { %2254 = vmatmul.mubr.msk.f32.vlgmr.msra.gmra.mrb[12].mxu0 %vm151_vm2, %v2568_v9 }
 0x89b   :  { %2262 = vmatpush3.xpose.msk.msra.mxu0 %vm151_vm2, %v1282_v22  ;;  %2263 = vmatprep.mubr.msk.f32.mxu0 %vm2470_vm1, %v2469_v8 }
 0x89c   :  { %2271 = vmatprep.subr.mxu0 %v2469_v8 }
 0x89e   :  { %2264 = vmatmul.mubr.msk.f32.vlgmr.msra.gmra.mrb[14].mxu0 %vm151_vm2, %v1280_v23 }
 0x89f   :  { %2272 = vmatpush3.msra.mxu0 %v2601_v30  ;;  %2273 = vmatprep.mubr.msk.f32.mxu0 %vm2470_vm1, %v2469_v8 }
 0x8a0   :  { %2281 = vmatprep.subr.mxu0 %v2469_v8 }
 0x969   :  { %v1027_v25 = vpop.f32.mrb[10].mxu0 }
 0x96a   :  { %v2245_v26 = vpop.f32.mrb[11].mxu0  ;;  %2249 = vmatmul.mubr.msk.f32.vlgmr.msra.gmra.mrb[12].mxu1 %vm151_vm2, %v1027_v25 }
 0x96b   :  { %2258 = vmatprep.mubr.msk.f32.mxu1 %vm2470_vm1, %v2469_v8 }
 0x96d   :  { %v1187_v27 = vpop.f32.mrb[12].mxu0 }
 0x96e   :  { %v2255_v28 = vpop.f32.mrb[13].mxu0  ;;  %v1191_v29 = vsel %vm151_vm2, %v1187_v27, -inf }
 0x96f   :  { %1192 = vmax.xlane.f32.xlu0 %v1191_v29 }
 0x971   :  { %v1353_v30 = vpop.f32.mrb[14].mxu0 }
 0x972   :  { %v2265_v31 = vpop.f32.mrb[15].mxu0  ;;  %v1357_v32 = vsel %vm151_vm2, %v1353_v30, -inf }
 0x973   :  { %1358 = vmax.xlane.f32.xlu1 %v1357_v32 }
 0x984   :  { %1202 = vrot.lane.b32.xlu1 %v2568_v9, %s2475_s30 }
 0x988   :  { %1593 = vrot.lane.b32.xlu1 %v2568_v9, %s2476_s5 }
 0x98c   :  { %1591 = vrot.lane.b32.xlu1 %v2568_v9, %s2477_s6 }
 0x9fc   :  { %v1193_v33 = vpop.xlane.xlu0 %1192 }
 0x9fd   :  { %v1194_v34 = vsub.f32 %v1187_v27, %v1193_v33 }
 0x9ff   :  { %v1195_v35 = vmul.f32 1.442695, %v1194_v34 }
 0xa00   :  { %v1359_v36 = vpop.xlane.xlu1 %1358 }
 0xa01   :  { %2354 = vpow2.f32 %v1195_v35  ;;  %v1360_v37 = vsub.f32 %v1353_v30, %v1359_v36 }
 0xa03   :  { %v1361_v38 = vmul.f32 1.442695, %v1360_v37 }
 0xa04   :  { %v1203_v40 = vpop.permute.xlu1 %1202 }
 0xa05   :  { %2356 = vpow2.f32 %v1361_v38  ;;  %2257 = vmatpush3.msra.mxu1 %v1203_v40 }
 0xa06   :  { %2266 = vmatprep.subr.mxu1 %v2469_v8 }
 0xa08   :  { %v1594_v59 = vpop.permute.xlu1 %1593 }
 0xa0b   :  { %v2355_v41 = vpop.eup %2354 }
 0xa0c   :  { %v1197_v42 = vsel %vm151_vm2, %v2355_v41, 0.0 }
 0xa0d   :  { %1198 = vadd.xlane.f32.xlu0 %v1197_v42 }
 0xa0f   :  { %v2357_v43 = vpop.eup %2356 }
 0xa10   :  { %v1363_v44 = vsel %vm151_vm2, %v2357_v43, 0.0 }
 0xa11   :  { %1364 = vadd.xlane.f32.xlu0 %v1363_v44 }
 0xa27   :  { %1368 = vrot.lane.b32.xlu0 %v2568_v9, %s2474_s29 }
 0xa3d   :  { %v1101_v46 = vpop.f32.mrb[12].mxu1 }
 0xa3e   :  { %v1105_v47 = vadd.f32 %v1101_v46, %v865_v10  ;;  %v2250_v48 = vpop.f32.mrb[13].mxu1 }
 0xa40   :  { %v1112_v49 = vadd.f32 %v2702_v45, %v1105_v47 }
 0xa42   :  { %1113 = vst.msk [vmem:[#allocation8] sm:$0xff] %vm65_vm0, %v1112_v49 }
 0xa9a   :  { %v1199_v50 = vpop.xlane.xlu0 %1198 }
 0xa9b   :  { %2358 = vrcp.f32 %v1199_v50 }
 0xa9e   :  { %v1365_v51 = vpop.xlane.xlu0 %1364 }
 0xa9f   :  { %2360 = vrcp.f32 %v1365_v51 }
 0xaa2   :  { %v1369_v54 = vpop.permute.xlu0 %1368 }
 0xaa5   :  { %v2359_v52 = vpop.eup %2358 }
 0xaa6   :  { %v1201_v53 = vmul.f32 %v2359_v52, %v2355_v41 }
 0xaa8   :  { %2259 = vmatmul.mubr.msk.f32.vlgmr.msra.gmra.mrb[14].mxu1 %vm151_vm2, %v1201_v53 }
 0xaa9   :  { %v2361_v55 = vpop.eup %2360  ;;  %2267 = vmatpush3.msra.mxu1 %v1369_v54  ;;  %2268 = vmatprep.mubr.msk.f32.mxu1 %vm2470_vm1, %v2469_v8 }
 0xaaa   :  { %v1367_v56 = vmul.f32 %v2361_v55, %v2357_v43  ;;  %2276 = vmatprep.subr.mxu1 %v2469_v8 }
 0xaac   :  { %2269 = vmatmul.mubr.msk.f32.vlgmr.msra.gmra.mrb[16].mxu1 %vm151_vm2, %v1367_v56 }
 0xaad   :  { %2277 = vmatpush3.msra.mxu1 %v2613_v39  ;;  %2278 = vmatprep.mubr.msk.f32.mxu1 %vm2470_vm1, %v2469_v8  ;;  %v1592_v39 = vpop.permute.xlu1 %1591 }
 0xaae   :  { %2286 = vmatprep.subr.mxu1 %v2469_v8 }
 0xb7b   :  { %v1274_v57 = vpop.f32.mrb[14].mxu1 }
 0xb7c   :  { %v2260_v58 = vpop.f32.mrb[15].mxu1  ;;  %2279 = vmatmul.mubr.msk.f32.vlgmr.msra.gmra.mrb[18].mxu1 %vm151_vm2, %v1274_v57 }
 0xb7d   :  { %2288 = vmatprep.mubr.msk.f32.mxu1 %vm2470_vm1, %v2469_v8 }
 0xb7f   :  { %v1440_v60 = vpop.f32.mrb[16].mxu1 }
 0xb80   :  { %v2270_v61 = vpop.f32.mrb[17].mxu1  ;;  %2274 = vmatmul.mubr.msk.f32.vlgmr.msra.gmra.mrb[16].mxu0 %vm151_vm2, %v1440_v60 }
 0xb81   :  { %2282 = vmatpush3.xpose.msk.msra.mxu0 %vm151_vm2, %v1594_v59  ;;  %2283 = vmatprep.mubr.msk.f32.mxu0 %vm2470_vm1, %v2469_v8 }
 0xb82   :  { %2291 = vmatprep.subr.mxu0 %v2469_v8 }
 0xb84   :  { %2284 = vmatmul.mubr.msk.f32.vlgmr.msra.gmra.mrb[18].mxu0 %vm151_vm2, %v1592_v39 }
 0xb85   :  { %2292 = vmatpush3.msra.mxu0 %v2647_v1  ;;  %2293 = vmatprep.mubr.msk.f32.mxu0 %vm2470_vm1, %v2469_v8 }
 0xb86   :  { %2301 = vmatprep.subr.mxu0 %v2469_v8 }
 0xc4f   :  { %v1587_v62 = vpop.f32.mrb[18].mxu1 }
 0xc50   :  { %v2280_v63 = vpop.f32.mrb[19].mxu1 }
 0xc53   :  { %v1514_v0 = vpop.f32.mrb[16].mxu0 }
 0xc54   :  { %v1588_v2 = vadd.f32 %v1587_v62, %v1514_v0  ;;  %v2275_v3 = vpop.f32.mrb[17].mxu0 }
 0xc57   :  { %v1665_v4 = vpop.f32.mrb[18].mxu0 }
 0xc58   :  { %v2285_v5 = vpop.f32.mrb[19].mxu0  ;;  %v1669_v6 = vsel %vm151_vm2, %v1665_v4, -inf }
 0xc59   :  { %1670 = vmax.xlane.f32.xlu0 %v1669_v6 }
 0xc6f   :  { %1680 = vrot.lane.b32.xlu0 %v2568_v9, %s2480_s9 }
 0xc73   :  { %1831 = vrot.lane.b32.xlu0 %v2568_v9, %s2479_s8 }
 0xce6   :  { %v1671_v1 = vpop.xlane.xlu0 %1670 }
 0xce7   :  { %v1672_v7 = vsub.f32 %v1665_v4, %v1671_v1 }
 0xce9   :  { %v1673_v11 = vmul.f32 1.442695, %v1672_v7 }
 0xcea   :  { %v1681_v12 = vpop.permute.xlu0 %1680 }
 0xceb   :  { %2362 = vpow2.f32 %v1673_v11  ;;  %2287 = vmatpush3.msra.mxu1 %v1681_v12 }
 0xcec   :  { %2296 = vmatprep.subr.mxu1 %v2469_v8 }
 0xcee   :  { %v1832_v18 = vpop.permute.xlu0 %1831 }
 0xcf5   :  { %v2363_v13 = vpop.eup %2362 }
 0xcf6   :  { %v1675_v14 = vsel %vm151_vm2, %v2363_v13, 0.0 }
 0xcf7   :  { %1676 = vadd.xlane.f32.xlu1 %v1675_v14 }
 0xd08   :  { %1833 = vrot.lane.b32.xlu1 %v2568_v9, %s2478_s7 }
 0xd84   :  { %v1677_v15 = vpop.xlane.xlu1 %1676 }
 0xd85   :  { %2364 = vrcp.f32 %v1677_v15 }
 0xd88   :  { %v1834_v17 = vpop.permute.xlu1 %1833 }
 0xd8f   :  { %v2365_v16 = vpop.eup %2364 }
 0xd90   :  { %v1679_v10 = vmul.f32 %v2365_v16, %v2363_v13 }
 0xd92   :  { %2289 = vmatmul.mubr.msk.f32.vlgmr.msra.gmra.mrb[20].mxu1 %vm151_vm2, %v1679_v10 }
 0xd93   :  { %2297 = vmatpush3.xpose.msk.msra.mxu1 %vm151_vm2, %v1834_v17  ;;  %2298 = vmatprep.mubr.msk.f32.mxu1 %vm2470_vm1, %v2469_v8 }
 0xd94   :  { %2306 = vmatprep.subr.mxu1 %v2469_v8 }
 0xd96   :  { %2299 = vmatmul.mubr.msk.f32.vlgmr.msra.gmra.mrb[22].mxu1 %vm151_vm2, %v1832_v18 }
 0xd97   :  { %2307 = vmatpush3.msra.mxu1 %v2679_v24  ;;  %2308 = vmatprep.mubr.msk.f32.mxu1 %vm2470_vm1, %v2469_v8 }
 0xe65   :  { %v1752_v19 = vpop.f32.mrb[20].mxu1 }
 0xe66   :  { %v2290_v20 = vpop.f32.mrb[21].mxu1  ;;  %2294 = vmatmul.mubr.msk.f32.vlgmr.msra.gmra.mrb[20].mxu0 %vm151_vm2, %v1752_v19 }
 0xe67   :  { %2303 = vmatprep.mubr.msk.f32.mxu0 %vm2470_vm1, %v2469_v8 }
 0xe69   :  { %v1905_v21 = vpop.f32.mrb[22].mxu1 }
 0xe6a   :  { %v2300_v22 = vpop.f32.mrb[23].mxu1  ;;  %v1909_v23 = vsel %vm151_vm2, %v1905_v21, -inf }
 0xe6b   :  { %1910 = vmax.xlane.f32.xlu1 %v1909_v23 }
 0xef8   :  { %v1911_v25 = vpop.xlane.xlu1 %1910 }
 0xef9   :  { %v1912_v26 = vsub.f32 %v1905_v21, %v1911_v25 }
 0xefb   :  { %v1913_v27 = vmul.f32 1.442695, %v1912_v26 }
 0xefd   :  { %2366 = vpow2.f32 %v1913_v27 }
 0xf07   :  { %v2367_v24 = vpop.eup %2366 }
 0xf08   :  { %v1915_v28 = vsel %vm151_vm2, %v2367_v24, 0.0 }
 0xf09   :  { %1916 = vadd.xlane.f32.xlu0 %v1915_v28 }
 0xf1f   :  { %1920 = vrot.lane.b32.xlu0 %v2568_v9, %s2481_s10 }
 0xf39   :  { %v1826_v29 = vpop.f32.mrb[20].mxu0 }
 0xf3a   :  { %v1830_v30 = vadd.f32 %v1826_v29, %v1588_v2  ;;  %v2295_v31 = vpop.f32.mrb[21].mxu0 }
 0xf96   :  { %v1917_v8 = vpop.xlane.xlu0 %1916 }
 0xf97   :  { %2368 = vrcp.f32 %v1917_v8 }
 0xf9a   :  { %v1921_v32 = vpop.permute.xlu0 %1920 }
 0xf9b   :  { %2302 = vmatpush3.msra.mxu0 %v1921_v32 }
 0xfa1   :  { %v2369_v33 = vpop.eup %2368 }
 0xfa2   :  { %v1919_v34 = vmul.f32 %v2369_v33, %v2367_v24 }
 0xfa4   :  { %2304 = vmatmul.mubr.msk.f32.vlgmr.msra.gmra.mrb[22].mxu0 %vm151_vm2, %v1919_v34 }
0x1077   :  { %v1992_v35 = vpop.f32.mrb[22].mxu0 }
0x1078   :  { %v2305_v36 = vpop.f32.mrb[23].mxu0  ;;  %2309 = vmatmul.mubr.msk.f32.vlgmr.msra.gmra.mrb[24].mxu1 %vm151_vm2, %v1992_v35 }
0x114b   :  { %v2066_v37 = vpop.f32.mrb[24].mxu1 }
0x114c   :  { %v2070_v38 = vadd.f32 %v2066_v37, %v1830_v30  ;;  %v2310_v9 = vpop.f32.mrb[25].mxu1 }
0x114e   :  { %v2071_v40 = vadd.f32 %v2702_v45, %v2070_v38 }
0x1150   :  { %2072 = vst.msk [vmem:[#allocation8 + $0x8] sm:$0xff] %vm65_vm0, %v2071_v40 }
0x1151   :  { %2447 = shalt.err (!%p2444_p0)
}
0x1152   :  { %s2448_s16 = scalar_lea.hbm %s2776_s4, 256 }
0x1153   :  { %p2449_p1 = scmp.ne.s32.totalorder %s2776_s4, %s2448_s16  ;;  %p2452_p2 = scmp.lt.u32.totalorder %s2448_s16, %s2776_s4 }
0x1155   :  { %p2454_p3 = pnand %p2452_p2, %p2449_p1 }
0x1157   :  { %2457 = shalt.err (!%p2454_p3)
}
0x1158   :  { %2084 = dma.vmem_to_hbm [thread:$0]  %s2079_s1, 256, %s2776_s4, [#allocation4], %s2466_s27, %s2466_s27, %s2467_s28  }
0x1159   :  { %2462 = dma.done.wait [#allocation4], 256  }
0x115a   :  { %2463 = vsyncadd [#allocation4], 4294967040 }
0x115b   :  { %2088 = vsyncpa [#allocation3], 1 }
0x115c   :  { %2089 = vsyncpa [#allocation6], 1 }
0x115d   :  { %2090 = vsyncpa [#allocation4], 1 }

</bundles_post_ra>
